<compile_context>
chip_gen: v7x
topology: tpu7x:2x2x1
jax: 0.10.0
libtpu: 0.0.40
codegen_flags: <defaults>
</compile_context>

<pallas_src>
import jax
import jax.numpy as jnp
from jax.experimental import pallas as pl
from jax.experimental.pallas import tpu as pltpu


def _attention_readout_kernel(states_ref, att_vecs_ref, head_map_ref,
                              w_out_t_ref, b_out_ref, out_ref):
    gb, n, d = states_ref.shape
    h = att_vecs_ref.shape[-1]

    s3 = states_ref[...]                                     # [GB, N, D] native dtype
    s2 = s3.reshape(gb * n, d)                               # [GB*N, D]

    # att_scores = einsum('bd,dh->bh'): native-dtype MXU matmul, f32 accumulate.
    scores = jnp.dot(s2, att_vecs_ref[...],
                     preferred_element_type=jnp.float32)     # [GB*N, H] f32
    scores3 = scores.reshape(gb, n, h)                       # [GB, N, H]

    # dgl.softmax_nodes, kept unnormalized: e = exp(scores - max_over_nodes).
    m = jnp.max(scores3, axis=1, keepdims=True)              # [GB, 1, H] f32
    e = jnp.exp(scores3 - m)                                 # [GB, N, H] f32
    denom = jnp.sum(e, axis=1)                               # [GB, H]    f32
    inv = pl.reciprocal(denom, approx=True)                  # [GB, H]    f32 (EUP)

    # Unnormalized per-head weighted node sum, done as one batched MXU
    # contraction over the node axis (contraction K = N, native dtype operands):
    #   per_head[g, h, d] = sum_n e[g, n, h] * states[g, n, d]
    per_head = jnp.einsum('gnh,gnd->ghd', e.astype(s3.dtype), s3,
                          preferred_element_type=jnp.float32)  # [GB, H, D] f32

    # Keep only each head's own feature slice (one-hot head map), sum over the
    # head axis, then normalize with the per-head softmax denominator expanded
    # to full feature width:  attn_summ == dgl.sum_nodes of v, flattened.
    hm = head_map_ref[...]                                   # [H, D] f32, one-hot
    masked = jnp.sum(per_head * hm[None, :, :], axis=1)      # [GB, D] f32
    inv_full = jnp.dot(inv, hm,
                       preferred_element_type=jnp.float32)   # [GB, D] f32
    attn_summ = masked * inv_full                            # [GB, D] f32

    # outnet: ret = attn_summ @ W^T + b (weight pre-transposed & lane-padded).
    ret = jnp.dot(attn_summ.astype(w_out_t_ref.dtype), w_out_t_ref[...],
                  preferred_element_type=jnp.float32)        # [GB, outdim_p] f32
    ret = ret + b_out_ref[...]                               # bias kept in f32
    out_ref[...] = ret.astype(out_ref.dtype)


def _tensorcores_per_chip() -> int:
    """2 on v7x (2 TensorCores/chip), else 1."""
    try:
        kind = jax.devices()[0].device_kind.lower()
    except Exception:
        return 1
    return 2 if ("v7" in kind or "7x" in kind) else 1


def attention_readout(states, att_vecs, w_out, b_out, *, num_heads,
                      vmem_block_budget_bytes=24 * 1024 * 1024):
    """states: [G, N, hdim]  ->  [G, outdim]."""
    G, N, D = states.shape
    outdim = w_out.shape[0]
    assert D % num_heads == 0
    head_dim = D // num_heads

    compute_dtype = states.dtype
    itemsize = states.dtype.itemsize
    lane = 128          # [*, H] temporaries are lane-padded to a full vreg width
    f32b = 4

    # ---- lane-dense output: pad outdim to a multiple of 128 ------------------
    outdim_p = pl.cdiv(outdim, 128) * 128

    # ---- choose graphs-per-block (GB) from an explicit VMEM budget -----------
    # Per-graph resident footprint inside the kernel (double-buffered blocks
    # plus the f32 softmax temporaries and per-head partials).
    per_graph = (2 * N * D * itemsize                 # states block (x2 buffers)
                 + 2 * N * lane * f32b                # scores + e (f32, lane-padded)
                 + N * lane * itemsize                # e cast to compute dtype
                 + 2 * max(num_heads, 8) * D * f32b   # per_head / masked partials
                 + 2 * D * f32b                       # attn_summ / inv_full rows
                 + 2 * outdim_p * itemsize)           # output block (x2 buffers)
    target = min(int(vmem_block_budget_bytes), 40 * 1024 * 1024)
    gb = max(1, min(G, target // max(per_graph, 1)))

    # v7x has 2 TensorCores: keep >= 2 grid steps so "parallel" shards both.
    n_cores = _tensorcores_per_chip()
    if n_cores >= 2 and G >= 2:
        gb = min(gb, pl.cdiv(G, n_cores))

    # Sublane-tile alignment of the output block's leading dim (8 f32 / 16 bf16).
    sublane = {1: 32, 2: 16, 4: 8}.get(itemsize, 8)
    if gb >= G:
        gb, num_steps = G, 1
    else:
        gb = max(sublane, (gb // sublane) * sublane)  # round down, keep >= tile
        if gb >= G:
            gb, num_steps = G, 1
        else:
            num_steps = pl.cdiv(G, gb)
    g_pad = num_steps * gb
    if g_pad != G:
        # Zero padding: padded graphs softmax over zero scores (finite, no NaN)
        # and are sliced off below.
        states = jnp.pad(states, ((0, g_pad - G), (0, 0), (0, 0)))

    # ---- weights, pre-cast / pre-transposed in the wrapper --------------------
    att_vecs_c = att_vecs.astype(compute_dtype)                       # [D, H]
    # one-hot head map [H, D]: head_map[h, d] = 1 iff d // head_dim == h (kept f32)
    head_map = (jnp.arange(D)[None, :] // head_dim ==
                jnp.arange(num_heads)[:, None]).astype(jnp.float32)
    w_out_t = (jnp.zeros((D, outdim_p), compute_dtype)
               .at[:, :outdim].set(w_out.T.astype(compute_dtype)))    # [D, outP]
    b_out_p = (jnp.zeros((1, outdim_p), jnp.float32)
               .at[0, :outdim].set(b_out.astype(jnp.float32)))        # [1, outP]

    # ---- explicit VMEM limit (blocks + double-buffered constant weights) -----
    weights_bytes = 2 * (D * lane * itemsize            # att_vecs (H lane-padded)
                         + 8 * D * f32b                 # head map (sublane-padded)
                         + D * outdim_p * itemsize      # pre-transposed Linear W
                         + 8 * outdim_p * f32b)         # bias
    vmem_limit = int(min(max(32 * 1024 * 1024,
                             int(1.25 * (gb * per_graph + weights_bytes))),
                         48 * 1024 * 1024))

    out = pl.pallas_call(
        _attention_readout_kernel,
        out_shape=jax.ShapeDtypeStruct((g_pad, outdim_p), states.dtype),
        grid_spec=pltpu.PrefetchScalarGridSpec(
            num_scalar_prefetch=0,
            grid=(num_steps,),
            in_specs=[
                pl.BlockSpec((gb, N, D), lambda g: (g, 0, 0)),      # states (GB graphs)
                pl.BlockSpec((D, num_heads), lambda g: (0, 0)),     # att_vecs (resident)
                pl.BlockSpec((num_heads, D), lambda g: (0, 0)),     # one-hot head map
                pl.BlockSpec((D, outdim_p), lambda g: (0, 0)),      # Linear weight (pre-T)
                pl.BlockSpec((1, outdim_p), lambda g: (0, 0)),      # Linear bias (f32)
            ],
            out_specs=pl.BlockSpec((gb, outdim_p), lambda g: (g, 0)),
        ),
        compiler_params=pltpu.CompilerParams(
            dimension_semantics=("parallel",),
            vmem_limit_bytes=vmem_limit),
    )(states, att_vecs_c, head_map, w_out_t, b_out_p)

    return out[:G, :outdim]


def _reference(states, att_vecs, w_out, b_out, num_heads):
    states = states.astype(jnp.float32)
    att_vecs = att_vecs.astype(jnp.float32)
    w_out = w_out.astype(jnp.float32)
    b_out = b_out.astype(jnp.float32)
    G, N, D = states.shape
    scores = jnp.einsum("gnd,dh->gnh", states, att_vecs)
    att_w = jax.nn.softmax(scores, axis=1)                   # softmax over nodes
    v = states.reshape(G, N, num_heads, D // num_heads) * att_w[:, :, :, None]
    attn_summ = jnp.sum(v, axis=1).reshape(G, D)
    return attn_summ @ w_out.T + b_out


if __name__ == "__main__":
    key = jax.random.PRNGKey(0)

    # ---- Case 1: small f32 (G=2 graphs, 8 nodes, hdim=32, 2 heads, outdim=32) --
    G, N, HDIM, NUM_HEADS, OUTDIM = 2, 8, 32, 2, 32
    k_states, k_att, k_w, k_b, key = jax.random.split(key, 5)
    states = jax.random.normal(k_states, (G, N, HDIM), dtype=jnp.float32)
    att_bound = (1.0 / NUM_HEADS) ** 0.5
    att_vecs = jax.random.uniform(k_att, (HDIM, NUM_HEADS), jnp.float32,
                                  minval=-att_bound, maxval=att_bound)
    lin_bound = (1.0 / HDIM) ** 0.5
    w_out = jax.random.uniform(k_w, (OUTDIM, HDIM), jnp.float32,
                               minval=-lin_bound, maxval=lin_bound)
    b_out = jax.random.uniform(k_b, (OUTDIM,), jnp.float32,
                               minval=-lin_bound, maxval=lin_bound)

    out = attention_readout(states, att_vecs, w_out, b_out, num_heads=NUM_HEADS)
    out = jax.block_until_ready(out)
    ref = _reference(states, att_vecs, w_out, b_out, NUM_HEADS)
    assert out.shape == (G, OUTDIM)
    # approx reciprocal in the softmax normalization -> slightly loose tolerance
    assert jnp.allclose(out, ref, atol=2e-2, rtol=2e-2), \
        float(jnp.max(jnp.abs(out - ref)))

    # ---- Case 2: bf16, multi-step grid (16-sublane blocks, native-dtype MXU) --
    G2, N2, D2, H2, OUT2 = 32, 64, 256, 4, 64
    k1, k2, k3, k4, key = jax.random.split(key, 5)
    states2 = jax.random.normal(k1, (G2, N2, D2), jnp.float32).astype(jnp.bfloat16)
    ab2 = (1.0 / H2) ** 0.5
    lb2 = (1.0 / D2) ** 0.5
    att2 = jax.random.uniform(k2, (D2, H2), jnp.float32,
                              minval=-ab2, maxval=ab2).astype(jnp.bfloat16)
    w2 = jax.random.uniform(k3, (OUT2, D2), jnp.float32,
                            minval=-lb2, maxval=lb2).astype(jnp.bfloat16)
    b2 = jax.random.uniform(k4, (OUT2,), jnp.float32,
                            minval=-lb2, maxval=lb2).astype(jnp.bfloat16)

    # Small budget forces several grid steps (exercises tiling + padding path).
    out2 = attention_readout(states2, att2, w2, b2, num_heads=H2,
                             vmem_block_budget_bytes=1 << 20)
    out2 = jax.block_until_ready(out2)
    ref2 = _reference(states2, att2, w2, b2, H2)
    assert out2.shape == (G2, OUT2)
    rel = (jnp.linalg.norm(out2.astype(jnp.float32) - ref2) /
           jnp.linalg.norm(ref2))
    assert float(rel) < 3e-2, float(rel)

    print("KERNEL_OK")
</pallas_src>

<mosaic_0001>
module attributes {stable_mosaic.version = 11 : i64} {
  func.func @_attention_readout_kernel(%arg0: i32, %arg1: memref<2x8x32xf32, #tpu.memory_space<vmem>>, %arg2: memref<32x2xf32, #tpu.memory_space<vmem>>, %arg3: memref<2x32xf32, #tpu.memory_space<vmem>>, %arg4: memref<32x128xf32, #tpu.memory_space<vmem>>, %arg5: memref<1x128xf32, #tpu.memory_space<vmem>>, %arg6: memref<2x128xf32, #tpu.memory_space<vmem>>) attributes {dimension_semantics = [#tpu.dimension_semantics<parallel>], iteration_bounds = array<i64: 1>, scalar_prefetch = 0 : i64, scratch_operands = 0 : i64, tpu.core_type = #tpu.core_type<tc>, window_params = [{transform_indices = @transform_0, window_bounds = array<i64: 2, 8, 32>}, {pipeline_mode = #tpu.pipeline_mode<synchronous>, transform_indices = @transform_1, window_bounds = array<i64: 32, 2>}, {pipeline_mode = #tpu.pipeline_mode<synchronous>, transform_indices = @transform_2, window_bounds = array<i64: 2, 32>}, {pipeline_mode = #tpu.pipeline_mode<synchronous>, transform_indices = @transform_3, window_bounds = array<i64: 32, 128>}, {pipeline_mode = #tpu.pipeline_mode<synchronous>, transform_indices = @transform_4, window_bounds = array<i64: 1, 128>}, {transform_indices = @transform_5, window_bounds = array<i64: 2, 128>}]} {
    %c0 = arith.constant 0 : index
    %c0_0 = arith.constant 0 : index
    %c0_1 = arith.constant 0 : index
    %0 = vector.load %arg1[%c0, %c0_0, %c0_1] : memref<2x8x32xf32, #tpu.memory_space<vmem>>, vector<2x8x32xf32>
    %1 = vector.shape_cast %0 : vector<2x8x32xf32> to vector<16x32xf32>
    %c0_2 = arith.constant 0 : index
    %c0_3 = arith.constant 0 : index
    %2 = vector.load %arg2[%c0_2, %c0_3] : memref<32x2xf32, #tpu.memory_space<vmem>>, vector<32x2xf32>
    %cst = arith.constant dense<0.000000e+00> : vector<16x2xf32>
    %3 = tpu.matmul %1, %2, %cst {dimension_numbers = #tpu.dot_dimension_numbers<[1], [0], [0], [1], [0, 0, 1, 1], [], []>} : vector<16x32xf32>, vector<32x2xf32>, vector<16x2xf32> -> vector<16x2xf32>
    %4 = vector.shape_cast %3 : vector<16x2xf32> to vector<2x8x2xf32>
    %cst_4 = arith.constant dense<0xFF800000> : vector<2x2xf32>
    %5 = vector.multi_reduction <maximumf>, %4, %cst_4 [1] : vector<2x8x2xf32> to vector<2x2xf32>
    %6 = vector.shape_cast %5 : vector<2x2xf32> to vector<2x1x2xf32>
    %7 = vector.broadcast %6 : vector<2x1x2xf32> to vector<2x8x2xf32>
    %8 = arith.subf %4, %7 : vector<2x8x2xf32>
    %9 = math.exp %8 : vector<2x8x2xf32>
    %cst_5 = arith.constant dense<0.000000e+00> : vector<2x2xf32>
    %10 = vector.multi_reduction <add>, %9, %cst_5 [1] : vector<2x8x2xf32> to vector<2x2xf32>
    %11 = tpu.reciprocal %10 {approx = true} : vector<2x2xf32> -> vector<2x2xf32>
    "tpu.trace_start"() <{level = 10 : i32, message = "gnh,gnd->ghd"}> : () -> ()
    %cst_6 = arith.constant dense<0.000000e+00> : vector<2x2x32xf32>
    %12 = tpu.matmul %9, %0, %cst_6 {dimension_numbers = #tpu.dot_dimension_numbers<[1], [1], [2], [2], [0, 0, 0, 2, 1, 2], [0], [0]>} : vector<2x8x2xf32>, vector<2x8x32xf32>, vector<2x2x32xf32> -> vector<2x2x32xf32>
    "tpu.trace_stop"() : () -> ()
    %c0_7 = arith.constant 0 : index
    %c0_8 = arith.constant 0 : index
    %13 = vector.load %arg3[%c0_7, %c0_8] : memref<2x32xf32, #tpu.memory_space<vmem>>, vector<2x32xf32>
    %14 = vector.shape_cast %13 : vector<2x32xf32> to vector<1x2x32xf32>
    %15 = vector.broadcast %14 : vector<1x2x32xf32> to vector<2x2x32xf32>
    %16 = arith.mulf %12, %15 : vector<2x2x32xf32>
    %cst_9 = arith.constant dense<0.000000e+00> : vector<2x32xf32>
    %17 = vector.multi_reduction <add>, %16, %cst_9 [1] : vector<2x2x32xf32> to vector<2x32xf32>
    %cst_10 = arith.constant dense<0.000000e+00> : vector<2x32xf32>
    %18 = tpu.matmul %11, %13, %cst_10 {dimension_numbers = #tpu.dot_dimension_numbers<[1], [0], [0], [1], [0, 0, 1, 1], [], []>} : vector<2x2xf32>, vector<2x32xf32>, vector<2x32xf32> -> vector<2x32xf32>
    %19 = arith.mulf %17, %18 : vector<2x32xf32>
    %c0_11 = arith.constant 0 : index
    %c0_12 = arith.constant 0 : index
    %20 = vector.load %arg4[%c0_11, %c0_12] : memref<32x128xf32, #tpu.memory_space<vmem>>, vector<32x128xf32>
    %cst_13 = arith.constant dense<0.000000e+00> : vector<2x128xf32>
    %21 = tpu.matmul %19, %20, %cst_13 {dimension_numbers = #tpu.dot_dimension_numbers<[1], [0], [0], [1], [0, 0, 1, 1], [], []>} : vector<2x32xf32>, vector<32x128xf32>, vector<2x128xf32> -> vector<2x128xf32>
    %c0_14 = arith.constant 0 : index
    %c0_15 = arith.constant 0 : index
    %22 = vector.load %arg5[%c0_14, %c0_15] : memref<1x128xf32, #tpu.memory_space<vmem>>, vector<1x128xf32>
    %23 = vector.broadcast %22 : vector<1x128xf32> to vector<2x128xf32>
    %24 = arith.addf %21, %23 : vector<2x128xf32>
    %c0_16 = arith.constant 0 : index
    %c0_17 = arith.constant 0 : index
    %25 = vector.load %arg6[%c0_16, %c0_17] : memref<2x128xf32, #tpu.memory_space<vmem>>, vector<2x128xf32>
    tpu.vector_store %arg6[%c0_16, %c0_17], %24 {strides = array<i32>} : memref<2x128xf32, #tpu.memory_space<vmem>>, vector<2x128xf32>,
    return
  }
  func.func @transform_0(%arg0: i32) -> (i32, i32, i32) {
    %c0_i32 = arith.constant 0 : i32
    %c0_i32_0 = arith.constant 0 : i32
    %c0_i32_1 = arith.constant 0 : i32
    return %arg0, %c0_i32, %c0_i32_0 : i32, i32, i32
  }
  func.func @transform_1(%arg0: i32) -> (i32, i32) {
    %c0_i32 = arith.constant 0 : i32
    %c0_i32_0 = arith.constant 0 : i32
    %c0_i32_1 = arith.constant 0 : i32
    return %c0_i32, %c0_i32_0 : i32, i32
  }
  func.func @transform_2(%arg0: i32) -> (i32, i32) {
    %c0_i32 = arith.constant 0 : i32
    %c0_i32_0 = arith.constant 0 : i32
    %c0_i32_1 = arith.constant 0 : i32
    return %c0_i32, %c0_i32_0 : i32, i32
  }
  func.func @transform_3(%arg0: i32) -> (i32, i32) {
    %c0_i32 = arith.constant 0 : i32
    %c0_i32_0 = arith.constant 0 : i32
    %c0_i32_1 = arith.constant 0 : i32
    return %c0_i32, %c0_i32_0 : i32, i32
  }
  func.func @transform_4(%arg0: i32) -> (i32, i32) {
    %c0_i32 = arith.constant 0 : i32
    %c0_i32_0 = arith.constant 0 : i32
    %c0_i32_1 = arith.constant 0 : i32
    return %c0_i32, %c0_i32_0 : i32, i32
  }
  func.func @transform_5(%arg0: i32) -> (i32, i32) {
    %c0_i32 = arith.constant 0 : i32
    %c0_i32_0 = arith.constant 0 : i32
    return %arg0, %c0_i32 : i32, i32
  }
}

</mosaic_0001>

<bundles_post_ra>
// kernel: tpu_custom_call.1
= control target key start
LH: loop header
LB: loop body
LE: loop exit
PB: predicated region body
PF: predicated region fallthrough
CT: control target
= control target key end

     0   :  { %10 = vsyncpa [#allocation3], 0  ;;  %s829_s0 = inlined_call_operand.hbm [shape: f32[2,8,32], index: 0, kind: input, shape index: {}]   ;;  %s830_s1 = inlined_call_operand.vmem [shape: f32[32,2], index: 1, kind: input, shape index: {}]   ;;  %s831_s2 = inlined_call_operand.vmem [shape: f32[2,32], index: 2, kind: input, shape index: {}]   ;;  %s832_s3 = inlined_call_operand.vmem [shape: f32[32,128], index: 3, kind: input, shape index: {}]   ;;  %s833_s4 = inlined_call_operand.vmem [shape: f32[1,128], index: 4, kind: input, shape index: {}]   ;;  %s834_s5 = inlined_call_operand.hbm [shape: f32[2,128], index: 5, kind: output, shape index: {}]  }
   0x1   :  { %11 = vsyncpa [#allocation4], 0  ;;  %s717_s18 = smov [#allocation2]   ;;  %s669_s22 = scalar_lea.hbm %s829_s0, 256 }
   0x2   :  { %s17_s19 = sshll.u32 %s717_s18, 4  ;;  %p670_p0 = scmp.ne.s32.totalorder %s829_s0, %s669_s22  ;;  %s18_s19 = int_to_ptr.vmem [resolvable:$true] %s17_s19 }
   0x3   :  { %p673_p1 = scmp.lt.u32.totalorder %s669_s22, %s829_s0 }
   0x5   :  { %p675_p2 = pnand %p673_p1, %p670_p0 }
   0x7   :  { %678 = shalt.err (!%p675_p2)
}
   0x8   :  { %s679_s27 = scalar_lea.vmem %s18_s19, 256  ;;  %p684_p4 = scmp.lt.s32.totalorder %s18_s19, %s18_s19 }
   0x9   :  { %p680_p3 = scmp.ne.s32.totalorder %s18_s19, %s679_s27  ;;  %p685_p5 = scmp.lt.s32.totalorder %s679_s27, %s679_s27 }
   0xb   :  { %p686_p6 = por %p685_p5, %p684_p4 }
   0xd   :  { %p687_p7 = pnand %p686_p6, %p680_p3 }
   0xf   :  { %690 = shalt.err (!%p687_p7)
}
  0x10   :  { %s718_s28 = smov 128   ;;  %s719_s29 = smov 8  }
  0x11   :  { %23 = dma.hbm_to_vmem [thread:$0]  %s829_s0, 256, %s18_s19, [#allocation3], %s718_s28, %s718_s28, %s719_s29  }
  0x12   :  { %713 = dma.done.wait [#allocation3], 256  }
  0x13   :  { %714 = vsyncadd [#allocation3], 4294967040  ;;  %vm41_vm0 = vcmask 261120   ;;  %v37_v0 = vld [vmem:[%s830_s1] sm:$0xff]  ;;  %v38_v1 = vld [vmem:[%s830_s1 + $0x8] sm:$0xff]  ;;  %v720_v8 = vmov 0.0  }
  0x14   :  { %v39_v2 = vld [vmem:[%s830_s1 + $0x10] sm:$0xff]  ;;  %v640_v3 = vpack.c.bf16 %v38_v1, %v37_v0  ;;  %v40_v4 = vld [vmem:[%s830_s1 + $0x18] sm:$0xff]  ;;  %v35_v5 = vld [vmem:[#allocation2] sm:$0xff]  ;;  %614 = vmatprep.subr.mxu1 %v720_v8  ;;  %vm721_vm1 = vmmov 0   ;;  %vm123_vm2 = vcmask 15360   ;;  %vm391_vm3 = vcmask 1041409  }
  0x15   :  { %v644_v6 = vpack.c.bf16 %v40_v4, %v39_v2  ;;  %611 = vmatprep.mubr.msk.f32.mxu0 %vm41_vm0, %v35_v5  ;;  %v36_v7 = vld [vmem:[#allocation2 + $0x8] sm:$0xff]  ;;  %616 = vmatprep.mubr.msk.f32.mxu1 %vm721_vm1, %v720_v8  ;;  %vm192_vm4 = vcmask 64512   ;;  %v371_v49 = vld [vmem:[%s831_s2] sm:$0x3]  ;;  %vm395_vm5 = vcmask 1041408   ;;  %v722_v54 = vmov 0.0|0.0  }
  0x16   :  { %641 = vmatprep.subr.bf16.mxu0 %v640_v3  ;;  %615 = vmatpush3.msra.mxu1 %v35_v5  ;;  %v475_v51 = vld [vmem:[%s832_s3] sm:$0xff]  ;;  %v476_v52 = vld [vmem:[%s832_s3 + $0x8] sm:$0xff]  ;;  %v477_v55 = vld [vmem:[%s832_s3 + $0x10] sm:$0xff]  ;;  %vm374_vm6 = vcmask 254976   ;;  %s723_s23 = smov [#allocation5]  }
  0x17   :  { %643 = vmatpush3.bf16.msra.mxu0 %v640_v3  ;;  %619 = vmatprep.subr.mxu1 %v720_v8  ;;  %v649_v53 = vpack.c.bf16 %v476_v52, %v475_v51  ;;  %v478_v56 = vld [vmem:[%s832_s3 + $0x18] sm:$0xff]  ;;  %s569_s24 = sshll.u32 %s723_s23, 4  ;;  %s570_s24 = int_to_ptr.vmem [resolvable:$true] %s569_s24 }
  0x18   :  { %645 = vmatprep.subr.bf16.mxu0 %v644_v6  ;;  %v652_v57 = vpack.c.bf16 %v478_v56, %v477_v55  ;;  %s691_s25 = scalar_lea.vmem %s570_s24, 32  ;;  %p696_p9 = scmp.lt.s32.totalorder %s570_s24, %s570_s24 }
  0x19   :  { %p692_p8 = scmp.ne.s32.totalorder %s570_s24, %s691_s25  ;;  %p697_p10 = scmp.lt.s32.totalorder %s691_s25, %s691_s25 }
  0x1b   :  { %647 = vmatpush3.bf16.msra.mxu0 %v644_v6  ;;  %p698_p11 = por %p697_p10, %p696_p9 }
  0x1c   :  { %648 = vmatprep.subr.bf16.mxu0 %v722_v54 }
  0x1d   :  { %p699_p12 = pnand %p698_p11, %p692_p8 }
  0x1e   :  { %612 = vmatmul.mubr.msk.f32.vlgmr.msra.gmra.mrb[0].mxu0 %vm41_vm0, %v36_v7 }
  0x1f   :  { %637 = vmatprep.mubr.msk.f32.mxu0 %vm721_vm1, %v720_v8  ;;  %650 = vmatpush3.bf16.msra.mxu0 %v649_v53 }
  0x20   :  { %651 = vmatprep.subr.bf16.mxu0 %v722_v54 }
  0x23   :  { %653 = vmatpush3.bf16.msra.mxu0 %v652_v57 }
  0xf1   :  { %v613_v9 = vpop.f32.mrb[0].mxu0 }
  0xf2   :  { %v131_v10 = vsel %vm123_vm2, %v613_v9, -inf  ;;  %v114_v11 = vpop.f32.mrb[1].mxu0 }
  0xf3   :  { %v132_v12 = vrot.slane %v131_v10, 4  ;;  %v124_v13 = vsel %vm123_vm2, %v114_v11, -inf }
  0xf4   :  { %v125_v14 = vrot.slane %v124_v13, 4 }
  0xf5   :  { %v133_v15 = vmax.f32 %v131_v10, %v132_v12 }
  0xf6   :  { %v126_v16 = vmax.f32 %v124_v13, %v125_v14 }
  0xf7   :  { %v134_v17 = vrot.slane %v133_v15, 2 }
  0xf8   :  { %v127_v18 = vrot.slane %v126_v16, 2 }
  0xf9   :  { %v135_v19 = vmax.f32 %v133_v15, %v134_v17 }
  0xfa   :  { %v128_v20 = vmax.f32 %v126_v16, %v127_v18 }
  0xfb   :  { %v136_v21 = vrot.slane %v135_v19, 1 }
  0xfc   :  { %v129_v22 = vrot.slane %v128_v20, 1 }
  0xfd   :  { %v137_v23 = vmax.f32 %v135_v19, %v136_v21  ;;  %v584_v21 = vld [vmem:[%s833_s4] ss:$0 sm:$0xff] }
  0xfe   :  { %v130_v24 = vmax.f32 %v128_v20, %v129_v22 }
  0xff   :  { %v139_v25 = vsub.f32 %v613_v9, %v137_v23 }
 0x100   :  { %v138_v26 = vsub.f32 %v114_v11, %v130_v24 }
 0x101   :  { %v142_v27 = vmul.f32 1.442695, %v139_v25 }
 0x102   :  { %v140_v28 = vmul.f32 1.442695, %v138_v26 }
 0x103   :  { %661 = vpow2.f32 %v142_v27 }
 0x104   :  { %663 = vpow2.f32 %v140_v28 }
 0x10d   :  { %v662_v29 = vpop.eup %661 }
 0x10e   :  { %v664_v30 = vpop.eup %663  ;;  %v151_v31 = vsel %vm123_vm2, %v662_v29, 0.0 }
 0x10f   :  { %v152_v32 = vrot.slane %v151_v31, 4  ;;  %v144_v33 = vsel %vm123_vm2, %v664_v30, 0.0  ;;  %160 = vxpose.xlu0.b32.start.end [1/1] (short) (narrow) %v664_v30, 8 }
 0x110   :  { %v145_v34 = vrot.slane %v144_v33, 4 }
 0x111   :  { %v153_v35 = vadd.f32 %v152_v32, %v151_v31 }
 0x112   :  { %v146_v36 = vadd.f32 %v145_v34, %v144_v33 }
 0x113   :  { %v154_v37 = vrot.slane %v153_v35, 2  ;;  %266 = vxpose.xlu0.b32.start.end [1/1] (short) (narrow) %v662_v29, 8 }
 0x114   :  { %v147_v38 = vrot.slane %v146_v36, 2 }
 0x115   :  { %v155_v39 = vadd.f32 %v154_v37, %v153_v35 }
 0x116   :  { %v148_v40 = vadd.f32 %v147_v38, %v146_v36 }
 0x117   :  { %v156_v41 = vrot.slane %v155_v39, 1 }
 0x118   :  { %v149_v42 = vrot.slane %v148_v40, 1 }
 0x119   :  { %v157_v43 = vadd.f32 %v156_v41, %v155_v39 }
 0x11a   :  { %v150_v44 = vadd.f32 %v149_v42, %v148_v40 }
 0x11b   :  { %665 = vrcp.f32 %v157_v43 }
 0x11c   :  { %667 = vrcp.f32 %v150_v44 }
 0x125   :  { %v666_v45 = vpop.eup %665 }
 0x126   :  { %v668_v46 = vpop.eup %667 }
 0x127   :  { %v392_v47 = vsel %vm391_vm3, %v666_v45, %v668_v46 }
 0x18f   :  { %v176_v48 = vpop.trf.xlu0 }
 0x190   :  { %617 = vmatmul.mubr.msk.f32.vlgmr.msra.gmra.mrb[0].mxu1 %vm192_vm4, %v176_v48 }
 0x191   :  { %620 = vmatpush3.msra.mxu1 %v36_v7  ;;  %621 = vmatprep.mubr.msk.f32.mxu1 %vm721_vm1, %v720_v8 }
 0x192   :  { %624 = vmatprep.subr.mxu1 %v720_v8 }
 0x193   :  { %v282_v50 = vpop.trf.xlu0 }
 0x194   :  { %622 = vmatmul.mubr.msk.f32.vlgmr.msra.gmra.mrb[2].mxu1 %vm192_vm4, %v282_v50 }
 0x195   :  { %625 = vmatpush3.msk.msra.mxu1 %vm395_vm5, %v371_v49  ;;  %626 = vmatprep.mubr.msk.f32.mxu1 %vm721_vm1, %v720_v8 }
 0x198   :  { %627 = vmatmul.mubr.msk.f32.vlgmr.msra.gmra.mrb[4].mxu1 %vm123_vm2, %v392_v47 }
 0x263   :  { %v262_v58 = vpop.f32.mrb[0].mxu1 }
 0x264   :  { %v372_v59 = vmul.f32 %v371_v49, %v262_v58  ;;  %v618_v60 = vpop.f32.mrb[1].mxu1 }
 0x266   :  { %v375_v61 = vsel %vm374_vm6, %v372_v59, 0.0 }
 0x267   :  { %v376_v62 = vrot.slane %v375_v61, 4  ;;  %v367_v63 = vpop.f32.mrb[2].mxu1 }
 0x268   :  { %v373_v0 = vmul.f32 %v371_v49, %v367_v63  ;;  %v623_v1 = vpop.f32.mrb[3].mxu1 }
 0x269   :  { %v377_v2 = vadd.f32 %v376_v62, %v375_v61 }
 0x26a   :  { %v382_v3 = vsel %vm374_vm6, %v373_v0, 0.0 }
 0x26b   :  { %v378_v4 = vrot.slane %v377_v2, 2  ;;  %v383_v5 = vrot.slane %v382_v3, 4  ;;  %v465_v6 = vpop.f32.mrb[4].mxu1 }
 0x26c   :  { %v628_v7 = vpop.f32.mrb[5].mxu1  ;;  %v470_v17 = vrot.slane %v465_v6, 1 }
 0x26d   :  { %v379_v8 = vadd.f32 %v378_v4, %v377_v2  ;;  %v384_v9 = vadd.f32 %v383_v5, %v382_v3 }
 0x26f   :  { %v385_v10 = vrot.slane %v384_v9, 2  ;;  %v380_v11 = vrot.slane %v379_v8, 1 }
 0x271   :  { %v386_v12 = vadd.f32 %v385_v10, %v384_v9  ;;  %v381_v13 = vadd.f32 %v380_v11, %v379_v8 }
 0x273   :  { %v387_v14 = vrot.slane %v386_v12, 1  ;;  %v473_v15 = vmul.f32 %v465_v6, %v381_v13 }
 0x275   :  { %v388_v16 = vadd.f32 %v387_v14, %v386_v12 }
 0x277   :  { %v474_v18 = vmul.f32 %v470_v17, %v388_v16 }
 0x279   :  { %v488_v19 = vrot.slane %v474_v18, 7 }
 0x27b   :  { %v489_v20 = vsel %vm391_vm3, %v488_v19, %v473_v15 }
 0x27c   :  { %638 = vmatmul.mubr.msk.f32.vlgmr.msra.gmra.mrb[2].mxu0 %vm41_vm0, %v489_v20 }
 0x34f   :  { %v558_v22 = vpop.f32.mrb[2].mxu0 }
 0x350   :  { %v559_v23 = vadd.f32 %v584_v21, %v558_v22  ;;  %v639_v24 = vpop.f32.mrb[3].mxu0 }
 0x352   :  { %562 = vst [vmem:[#allocation5] sm:$0x3] %v559_v23 }
 0x353   :  { %702 = shalt.err (!%p699_p12)
}
 0x354   :  { %s703_s28 = scalar_lea.hbm %s834_s5, 32 }
 0x355   :  { %p704_p13 = scmp.ne.s32.totalorder %s834_s5, %s703_s28  ;;  %p707_p0 = scmp.lt.u32.totalorder %s703_s28, %s834_s5 }
 0x357   :  { %p709_p1 = pnand %p707_p0, %p704_p13 }
 0x359   :  { %712 = shalt.err (!%p709_p1)
}
 0x35a   :  { %572 = dma.vmem_to_hbm [thread:$0]  %s570_s24, 32, %s834_s5, [#allocation4]  }
 0x35b   :  { %715 = dma.done.wait [#allocation4], 32  }
 0x35c   :  { %716 = vsyncadd [#allocation4], 4294967264 }
 0x35d   :  { %576 = vsyncpa [#allocation3], 1 }
 0x35e   :  { %577 = vsyncpa [#allocation4], 1 }

</bundles_post_ra>
